<compile_context>
chip_gen: v7x
topology: tpu7x:2x2x1
jax: 0.10.0
libtpu: 0.0.40
codegen_flags: <defaults>
</compile_context>

<pallas_src>
import functools

import numpy as np
import jax
import jax.numpy as jnp
from jax.experimental import pallas as pl
from jax.experimental.pallas import tpu as pltpu


# ---------------------------------------------------------------------------
# helpers
# ---------------------------------------------------------------------------
def _round_up(x, m):
    return ((x + m - 1) // m) * m


def _pick_batch_tile(B, tb_max=1024):
    """Tiny batch -> one tile of the padded batch (no wasted padding compute).
    Larger batches -> big tiles (fewer grid steps, amortized per-step overhead),
    but always keep >=2 grid steps so the 'parallel' axis can shard across the
    two TensorCores on v7x."""
    Bp8 = _round_up(max(B, 1), 8)
    if Bp8 <= 256:
        return Bp8
    if Bp8 < 512:
        return 128
    tile = 256
    while tile * 2 <= tb_max and Bp8 >= 4 * tile:
        tile *= 2
    return tile


# ---------------------------------------------------------------------------
# Parameter init (deterministic, PyTorch-like uniform bounds)
# ---------------------------------------------------------------------------
def init_params(key, D):
    kW1, kb1, kWih, kWhh, kbih, kbhh = jax.random.split(key, 6)
    bound = 1.0 / np.sqrt(D)
    params = {
        # nn.Linear(D, D): weight (out, in), bias (out,)
        "W1": jax.random.uniform(kW1, (D, D), jnp.float32, -bound, bound),
        "b1": jax.random.uniform(kb1, (D,), jnp.float32, -bound, bound),
        # nn.LSTMCell(D, D): gate order i, f, g, o
        "Wih": jax.random.uniform(kWih, (4 * D, D), jnp.float32, -bound, bound),
        "Whh": jax.random.uniform(kWhh, (4 * D, D), jnp.float32, -bound, bound),
        "bih": jax.random.uniform(kbih, (4 * D,), jnp.float32, -bound, bound),
        "bhh": jax.random.uniform(kbhh, (4 * D,), jnp.float32, -bound, bound),
    }
    return {k: np.asarray(v) for k, v in params.items()}


# ---------------------------------------------------------------------------
# One-time weight packing: pre-transposed, zero-padded, lane-dense, on device.
# Called once at model init — NOT per forward step.
# ---------------------------------------------------------------------------
def pack_params(params, D, weight_dtype=jnp.bfloat16):
    Dp = _round_up(D, 128)     # padded input / hidden dim (lane-dense)
    Hp = Dp

    W1p = np.zeros((Dp, Dp), np.float32)
    W1p[:D, :D] = params["W1"].T                  # x @ W1p == x @ W1^T
    b1p = np.zeros((1, Dp), np.float32)
    b1p[0, :D] = params["b1"]

    # Fused gate weight [Wih^T ; Whh^T] -> (2*Dp, 4*Hp):
    # gates = concat([x1, h0], axis=-1) @ Wg  computes both contributions in
    # one K = 2*Dp matmul.
    Wg = np.zeros((2 * Dp, 4 * Hp), np.float32)
    for g in range(4):
        Wg[:D, g * Hp:g * Hp + D] = params["Wih"][g * D:(g + 1) * D, :].T
        Wg[Dp:Dp + D, g * Hp:g * Hp + D] = params["Whh"][g * D:(g + 1) * D, :].T

    bsum = params["bih"] + params["bhh"]
    bgp = np.zeros((1, 4 * Hp), np.float32)
    for g in range(4):
        bgp[0, g * Hp:g * Hp + D] = bsum[g * D:(g + 1) * D]

    return {
        "W1": jnp.asarray(W1p, weight_dtype),
        "b1": jnp.asarray(b1p, jnp.float32),
        "Wg": jnp.asarray(Wg, weight_dtype),
        "bg": jnp.asarray(bgp, jnp.float32),
    }


# ---------------------------------------------------------------------------
# Pallas kernels
# ---------------------------------------------------------------------------
def _linear_tanh_kernel(x_ref, w1_ref, b1_ref, emb_ref):
    cdt = w1_ref.dtype
    z = jnp.dot(x_ref[...].astype(cdt), w1_ref[...],
                preferred_element_type=jnp.float32)
    emb_ref[...] = jnp.tanh(z + b1_ref[...])


def _linear_tanh_lstm_kernel(x_ref, hc0_ref, w1_ref, b1_ref, wg_ref, bg_ref,
                             hc_ref):
    cdt = w1_ref.dtype
    Hp = hc0_ref.shape[1] // 2

    # x1 = tanh(Linear(image))
    z = jnp.dot(x_ref[...].astype(cdt), w1_ref[...],
                preferred_element_type=jnp.float32)
    x1 = jnp.tanh(z + b1_ref[...])

    h0 = hc0_ref[:, :Hp]
    c0 = hc0_ref[:, Hp:]

    # Single fused gate matmul: K = 2*Dp, N = 4*Hp.  Concat is at a 128-lane
    # boundary, so it is layout-free.
    xh = jnp.concatenate([x1.astype(cdt), h0.astype(cdt)], axis=-1)
    gates = jnp.dot(xh, wg_ref[...],
                    preferred_element_type=jnp.float32) + bg_ref[...]

    # Elementwise / transcendental math kept in f32 (v5e has no bf16 VPU/EUP).
    i = jax.nn.sigmoid(gates[:, 0 * Hp:1 * Hp])
    f = jax.nn.sigmoid(gates[:, 1 * Hp:2 * Hp])
    g = jnp.tanh(gates[:, 2 * Hp:3 * Hp])
    o = jax.nn.sigmoid(gates[:, 3 * Hp:4 * Hp])

    c_new = f * c0 + i * g
    h_new = o * jnp.tanh(c_new)

    hc_ref[:, :Hp] = h_new
    hc_ref[:, Hp:] = c_new


# ---------------------------------------------------------------------------
# Jitted forward: pad -> one Pallas kernel -> slice/concat, all in one program
# ---------------------------------------------------------------------------
@functools.partial(jax.jit, static_argnames=("D", "use_memory", "tb_max"))
def _forward(image, memory, W1, b1, Wg, bg, *, D, use_memory, tb_max):
    B = image.shape[0]
    Dp = W1.shape[0]
    Hp = Dp

    tb = _pick_batch_tile(B, tb_max)
    Bp = _round_up(B, tb)
    grid = (Bp // tb,)
    dim_sem = ("parallel",)

    xp = jnp.zeros((Bp, Dp), jnp.float32).at[:B, :D].set(image.astype(jnp.float32))

    if not use_memory:
        cost = pl.CostEstimate(
            flops=2 * Bp * Dp * Dp,
            transcendentals=Bp * Dp,
            bytes_accessed=4 * (2 * Bp * Dp) + 2 * Dp * Dp,
        )
        emb_p = pl.pallas_call(
            _linear_tanh_kernel,
            out_shape=jax.ShapeDtypeStruct((Bp, Dp), jnp.float32),
            grid_spec=pltpu.PrefetchScalarGridSpec(
                num_scalar_prefetch=0,
                grid=grid,
                in_specs=[
                    pl.BlockSpec((tb, Dp), lambda i: (i, 0)),    # image tile
                    pl.BlockSpec((Dp, Dp), lambda i: (0, 0)),    # W1 (resident)
                    pl.BlockSpec((1, Dp), lambda i: (0, 0)),     # b1
                ],
                out_specs=pl.BlockSpec((tb, Dp), lambda i: (i, 0)),
            ),
            compiler_params=pltpu.CompilerParams(dimension_semantics=dim_sem),
            cost_estimate=cost,
        )(xp, W1, b1)
        return emb_p[:B, :D], memory

    # Padded [h | c] carry in one lane-dense array.
    hc0 = jnp.zeros((Bp, 2 * Hp), jnp.float32)
    hc0 = hc0.at[:B, :D].set(memory[:, :D].astype(jnp.float32))
    hc0 = hc0.at[:B, Hp:Hp + D].set(memory[:, D:].astype(jnp.float32))

    mm_flops = 2 * Bp * (Dp * Dp + (2 * Dp) * (4 * Hp))
    wbytes = 2 * (Dp * Dp + 2 * Dp * 4 * Hp)
    cost = pl.CostEstimate(
        flops=mm_flops,
        transcendentals=Bp * (Dp + 6 * Hp),
        bytes_accessed=4 * Bp * (Dp + 6 * Hp) + wbytes,
    )

    hc_new = pl.pallas_call(
        _linear_tanh_lstm_kernel,
        out_shape=jax.ShapeDtypeStruct((Bp, 2 * Hp), jnp.float32),
        grid_spec=pltpu.PrefetchScalarGridSpec(
            num_scalar_prefetch=0,
            grid=grid,
            in_specs=[
                pl.BlockSpec((tb, Dp), lambda i: (i, 0)),          # image tile
                pl.BlockSpec((tb, 2 * Hp), lambda i: (i, 0)),      # [h0 | c0] tile
                pl.BlockSpec((Dp, Dp), lambda i: (0, 0)),          # W1 (resident)
                pl.BlockSpec((1, Dp), lambda i: (0, 0)),           # b1
                pl.BlockSpec((2 * Dp, 4 * Hp), lambda i: (0, 0)),  # [Wih^T;Whh^T]
                pl.BlockSpec((1, 4 * Hp), lambda i: (0, 0)),       # bih + bhh
            ],
            out_specs=pl.BlockSpec((tb, 2 * Hp), lambda i: (i, 0)),
        ),
        compiler_params=pltpu.CompilerParams(dimension_semantics=dim_sem),
        cost_estimate=cost,
    )(xp, hc0, W1, b1, Wg, bg)

    h = hc_new[:B, :D]
    c = hc_new[:B, Hp:Hp + D]
    return h, jnp.concatenate([h, c], axis=1)


# ---------------------------------------------------------------------------
# Module wrapper: packs weights once, forward is one jitted program
# ---------------------------------------------------------------------------
class FlatInputPallas:
    def __init__(self, params, D, *, use_memory=True, use_text=False,
                 weight_dtype=jnp.bfloat16, tb_max=1024):
        if use_text:
            # TODO(synk): use_text=True path (nn.Embedding + nn.GRU over obs.text)
            # is not lowered to Pallas.
            raise NotImplementedError("use_text=True path is not implemented")
        self.D = D
        self.use_memory = use_memory
        self.tb_max = tb_max
        self.packed = pack_params(params, D, weight_dtype)   # device, once

    def __call__(self, image, memory):
        p = self.packed
        return _forward(image, memory, p["W1"], p["b1"], p["Wg"], p["bg"],
                        D=self.D, use_memory=self.use_memory,
                        tb_max=self.tb_max)


# ---------------------------------------------------------------------------
# Pure numpy reference (PyTorch semantics) for validation
# ---------------------------------------------------------------------------
def _sigmoid(x):
    return 1.0 / (1.0 + np.exp(-x))


def ref_forward(image, memory, params, use_memory):
    x = np.tanh(image @ params["W1"].T + params["b1"])
    if not use_memory:
        return x, memory
    H = x.shape[1]
    h0, c0 = memory[:, :H], memory[:, H:]
    gates = x @ params["Wih"].T + params["bih"] + h0 @ params["Whh"].T + params["bhh"]
    i, f, g, o = np.split(gates, 4, axis=1)
    i, f, g, o = _sigmoid(i), _sigmoid(f), np.tanh(g), _sigmoid(o)
    c = f * c0 + i * g
    h = o * np.tanh(c)
    return h, np.concatenate([h, c], axis=1)


# ---------------------------------------------------------------------------
# Demo / correctness check
# ---------------------------------------------------------------------------
if __name__ == "__main__":
    key = jax.random.PRNGKey(0)
    D = 64                      # obs_space['image'][0] -> input_dim == hidden size
    B = 2

    kp, ki, km = jax.random.split(key, 3)
    params = init_params(kp, D)
    image = jax.random.normal(ki, (B, D), jnp.float32)
    memory = jax.random.normal(km, (B, 2 * D), jnp.float32)

    # use_memory=True path: Linear + Tanh -> LSTMCell (single fused kernel)
    model_mem = FlatInputPallas(params, D, use_memory=True)
    emb, mem_out = model_mem(image, memory)
    emb, mem_out = jax.block_until_ready((emb, mem_out))
    assert emb.shape == (B, D) and mem_out.shape == (B, 2 * D)

    ref_emb, ref_mem = ref_forward(np.asarray(image), np.asarray(memory), params, True)
    assert np.allclose(np.asarray(emb), ref_emb, atol=2e-2, rtol=2e-2)
    assert np.allclose(np.asarray(mem_out), ref_mem, atol=2e-2, rtol=2e-2)

    # use_memory=False path: Linear + Tanh only, memory passthrough
    model_nomem = FlatInputPallas(params, D, use_memory=False)
    emb2, mem2 = model_nomem(image, memory)
    emb2, mem2 = jax.block_until_ready((emb2, mem2))
    ref_emb2, _ = ref_forward(np.asarray(image), np.asarray(memory), params, False)
    assert np.allclose(np.asarray(emb2), ref_emb2, atol=2e-2, rtol=2e-2)
    assert np.allclose(np.asarray(mem2), np.asarray(memory))

    print("KERNEL_OK")
</pallas_src>

<mosaic_0001>
module attributes {stable_mosaic.version = 11 : i64} {
  func.func @_linear_tanh_lstm_kernel(%arg0: i32, %arg1: memref<8x128xf32, #tpu.memory_space<vmem>>, %arg2: memref<8x256xf32, #tpu.memory_space<vmem>>, %arg3: memref<128x128xbf16, #tpu.memory_space<vmem>>, %arg4: memref<1x128xf32, #tpu.memory_space<vmem>>, %arg5: memref<256x512xbf16, #tpu.memory_space<vmem>>, %arg6: memref<1x512xf32, #tpu.memory_space<vmem>>, %arg7: memref<8x256xf32, #tpu.memory_space<vmem>>) attributes {dimension_semantics = [#tpu.dimension_semantics<parallel>], iteration_bounds = array<i64: 1>, scalar_prefetch = 0 : i64, scratch_operands = 0 : i64, tpu.core_type = #tpu.core_type<tc>, window_params = [{transform_indices = @transform_0, window_bounds = array<i64: 8, 128>}, {transform_indices = @transform_1, window_bounds = array<i64: 8, 256>}, {pipeline_mode = #tpu.pipeline_mode<synchronous>, transform_indices = @transform_2, window_bounds = array<i64: 128, 128>}, {pipeline_mode = #tpu.pipeline_mode<synchronous>, transform_indices = @transform_3, window_bounds = array<i64: 1, 128>}, {pipeline_mode = #tpu.pipeline_mode<synchronous>, transform_indices = @transform_4, window_bounds = array<i64: 256, 512>}, {pipeline_mode = #tpu.pipeline_mode<synchronous>, transform_indices = @transform_5, window_bounds = array<i64: 1, 512>}, {transform_indices = @transform_6, window_bounds = array<i64: 8, 256>}]} {
    %c0 = arith.constant 0 : index
    %c0_0 = arith.constant 0 : index
    %0 = vector.load %arg1[%c0, %c0_0] : memref<8x128xf32, #tpu.memory_space<vmem>>, vector<8x128xf32>
    %1 = arith.truncf %0 : vector<8x128xf32> to vector<8x128xbf16>
    %c0_1 = arith.constant 0 : index
    %c0_2 = arith.constant 0 : index
    %2 = vector.load %arg3[%c0_1, %c0_2] : memref<128x128xbf16, #tpu.memory_space<vmem>>, vector<128x128xbf16>
    %cst = arith.constant dense<0.000000e+00> : vector<8x128xf32>
    %3 = tpu.matmul %1, %2, %cst {dimension_numbers = #tpu.dot_dimension_numbers<[1], [0], [0], [1], [0, 0, 1, 1], [], []>} : vector<8x128xbf16>, vector<128x128xbf16>, vector<8x128xf32> -> vector<8x128xf32>
    %c0_3 = arith.constant 0 : index
    %c0_4 = arith.constant 0 : index
    %4 = vector.load %arg4[%c0_3, %c0_4] : memref<1x128xf32, #tpu.memory_space<vmem>>, vector<1x128xf32>
    %5 = vector.broadcast %4 : vector<1x128xf32> to vector<8x128xf32>
    %6 = arith.addf %3, %5 : vector<8x128xf32>
    %7 = math.tanh %6 : vector<8x128xf32>
    %c0_5 = arith.constant 0 : index
    %c0_6 = arith.constant 0 : index
    %8 = vector.load %arg2[%c0_5, %c0_6] : memref<8x256xf32, #tpu.memory_space<vmem>>, vector<8x128xf32>
    %c0_7 = arith.constant 0 : index
    %c128 = arith.constant 128 : index
    %9 = vector.load %arg2[%c0_7, %c128] : memref<8x256xf32, #tpu.memory_space<vmem>>, vector<8x128xf32>
    %10 = arith.truncf %7 : vector<8x128xf32> to vector<8x128xbf16>
    %11 = arith.truncf %8 : vector<8x128xf32> to vector<8x128xbf16>
    %12 = tpu.concatenate %10, %11 in 1 : vector<8x128xbf16>, vector<8x128xbf16> -> vector<8x256xbf16>
    %c0_8 = arith.constant 0 : index
    %c0_9 = arith.constant 0 : index
    %13 = vector.load %arg5[%c0_8, %c0_9] : memref<256x512xbf16, #tpu.memory_space<vmem>>, vector<256x512xbf16>
    %cst_10 = arith.constant dense<0.000000e+00> : vector<8x512xf32>
    %14 = tpu.matmul %12, %13, %cst_10 {dimension_numbers = #tpu.dot_dimension_numbers<[1], [0], [0], [1], [0, 0, 1, 1], [], []>} : vector<8x256xbf16>, vector<256x512xbf16>, vector<8x512xf32> -> vector<8x512xf32>
    %c0_11 = arith.constant 0 : index
    %c0_12 = arith.constant 0 : index
    %15 = vector.load %arg6[%c0_11, %c0_12] : memref<1x512xf32, #tpu.memory_space<vmem>>, vector<1x512xf32>
    %16 = vector.broadcast %15 : vector<1x512xf32> to vector<8x512xf32>
    %17 = arith.addf %14, %16 : vector<8x512xf32>
    %18 = vector.extract_strided_slice %17 {offsets = [0, 0], sizes = [8, 128], strides = [1, 1]} : vector<8x512xf32> to vector<8x128xf32>
    %19 = arith.negf %18 : vector<8x128xf32>
    %20 = math.exp %19 : vector<8x128xf32>
    %cst_13 = arith.constant 1.000000e+00 : f32
    %21 = vector.broadcast %cst_13 : f32 to vector<8x128xf32>
    %22 = arith.addf %21, %20 : vector<8x128xf32>
    %23 = arith.divf %21, %22 : vector<8x128xf32>
    %24 = vector.extract_strided_slice %17 {offsets = [0, 128], sizes = [8, 128], strides = [1, 1]} : vector<8x512xf32> to vector<8x128xf32>
    %25 = arith.negf %24 : vector<8x128xf32>
    %26 = math.exp %25 : vector<8x128xf32>
    %cst_14 = arith.constant 1.000000e+00 : f32
    %27 = vector.broadcast %cst_14 : f32 to vector<8x128xf32>
    %28 = arith.addf %27, %26 : vector<8x128xf32>
    %29 = arith.divf %27, %28 : vector<8x128xf32>
    %30 = vector.extract_strided_slice %17 {offsets = [0, 256], sizes = [8, 128], strides = [1, 1]} : vector<8x512xf32> to vector<8x128xf32>
    %31 = math.tanh %30 : vector<8x128xf32>
    %32 = vector.extract_strided_slice %17 {offsets = [0, 384], sizes = [8, 128], strides = [1, 1]} : vector<8x512xf32> to vector<8x128xf32>
    %33 = arith.negf %32 : vector<8x128xf32>
    %34 = math.exp %33 : vector<8x128xf32>
    %cst_15 = arith.constant 1.000000e+00 : f32
    %35 = vector.broadcast %cst_15 : f32 to vector<8x128xf32>
    %36 = arith.addf %35, %34 : vector<8x128xf32>
    %37 = arith.divf %35, %36 : vector<8x128xf32>
    %38 = arith.mulf %29, %9 : vector<8x128xf32>
    %39 = arith.mulf %23, %31 : vector<8x128xf32>
    %40 = arith.addf %38, %39 : vector<8x128xf32>
    %41 = math.tanh %40 : vector<8x128xf32>
    %42 = arith.mulf %37, %41 : vector<8x128xf32>
    %c0_16 = arith.constant 0 : index
    %c0_17 = arith.constant 0 : index
    %43 = vector.load %arg7[%c0_16, %c0_17] : memref<8x256xf32, #tpu.memory_space<vmem>>, vector<8x128xf32>
    tpu.vector_store %arg7[%c0_16, %c0_17], %42 {strides = array<i32>} : memref<8x256xf32, #tpu.memory_space<vmem>>, vector<8x128xf32>,
    %c0_18 = arith.constant 0 : index
    %c128_19 = arith.constant 128 : index
    %44 = vector.load %arg7[%c0_18, %c128_19] : memref<8x256xf32, #tpu.memory_space<vmem>>, vector<8x128xf32>
    tpu.vector_store %arg7[%c0_18, %c128_19], %40 {strides = array<i32>} : memref<8x256xf32, #tpu.memory_space<vmem>>, vector<8x128xf32>,
    return
  }
  func.func @transform_0(%arg0: i32) -> (i32, i32) {
    %c0_i32 = arith.constant 0 : i32
    %c0_i32_0 = arith.constant 0 : i32
    return %arg0, %c0_i32 : i32, i32
  }
  func.func @transform_1(%arg0: i32) -> (i32, i32) {
    %c0_i32 = arith.constant 0 : i32
    %c0_i32_0 = arith.constant 0 : i32
    return %arg0, %c0_i32 : i32, i32
  }
  func.func @transform_2(%arg0: i32) -> (i32, i32) {
    %c0_i32 = arith.constant 0 : i32
    %c0_i32_0 = arith.constant 0 : i32
    %c0_i32_1 = arith.constant 0 : i32
    return %c0_i32, %c0_i32_0 : i32, i32
  }
  func.func @transform_3(%arg0: i32) -> (i32, i32) {
    %c0_i32 = arith.constant 0 : i32
    %c0_i32_0 = arith.constant 0 : i32
    %c0_i32_1 = arith.constant 0 : i32
    return %c0_i32, %c0_i32_0 : i32, i32
  }
  func.func @transform_4(%arg0: i32) -> (i32, i32) {
    %c0_i32 = arith.constant 0 : i32
    %c0_i32_0 = arith.constant 0 : i32
    %c0_i32_1 = arith.constant 0 : i32
    return %c0_i32, %c0_i32_0 : i32, i32
  }
  func.func @transform_5(%arg0: i32) -> (i32, i32) {
    %c0_i32 = arith.constant 0 : i32
    %c0_i32_0 = arith.constant 0 : i32
    %c0_i32_1 = arith.constant 0 : i32
    return %c0_i32, %c0_i32_0 : i32, i32
  }
  func.func @transform_6(%arg0: i32) -> (i32, i32) {
    %c0_i32 = arith.constant 0 : i32
    %c0_i32_0 = arith.constant 0 : i32
    return %arg0, %c0_i32 : i32, i32
  }
}

</mosaic_0001>

<bundles_post_ra>
// kernel: _forward.1
= control target key start
LH: loop header
LB: loop body
LE: loop exit
PB: predicated region body
PF: predicated region fallthrough
CT: control target
= control target key end

     0   :  { %11 = vsyncpa [#allocation3], 0  ;;  %s931_s21 = smov [#allocation2]   ;;  %s1028_s0 = inlined_call_operand.vmem [shape: f32[8,128], index: 0, kind: input, shape index: {}]   ;;  %s1029_s1 = inlined_call_operand.vmem [shape: f32[8,256], index: 1, kind: input, shape index: {}]   ;;  %s1030_s2 = inlined_call_operand.vmem [shape: bf16[128,128], index: 2, kind: input, shape index: {}]   ;;  %s1031_s3 = inlined_call_operand.vmem [shape: f32[1,128], index: 3, kind: input, shape index: {}]   ;;  %s1032_s4 = inlined_call_operand.hbm [shape: bf16[256,512], index: 4, kind: input, shape index: {}]   ;;  %s1033_s5 = inlined_call_operand.vmem [shape: f32[1,512], index: 5, kind: input, shape index: {}]   ;;  %s1034_s6 = inlined_call_operand.vmem [shape: f32[8,256], index: 6, kind: output, shape index: {}]  }
   0x1   :  { %s25_s22 = sshll.u32 %s931_s21, 4  ;;  %s907_s25 = scalar_lea.hbm %s1032_s4, 8192  ;;  %s26_s22 = int_to_ptr.vmem [resolvable:$true] %s25_s22 }
   0x2   :  { %p908_p0 = scmp.ne.s32.totalorder %s1032_s4, %s907_s25  ;;  %p911_p1 = scmp.lt.u32.totalorder %s907_s25, %s1032_s4 }
   0x4   :  { %p913_p2 = pnand %p911_p1, %p908_p0 }
   0x6   :  { %916 = shalt.err (!%p913_p2)
}
   0x7   :  { %s917_s30 = scalar_lea.vmem %s26_s22, 8192  ;;  %p922_p4 = scmp.lt.s32.totalorder %s26_s22, %s26_s22 }
   0x8   :  { %p918_p3 = scmp.ne.s32.totalorder %s26_s22, %s917_s30  ;;  %p923_p5 = scmp.lt.s32.totalorder %s917_s30, %s917_s30 }
   0xa   :  { %p924_p6 = por %p923_p5, %p922_p4 }
   0xc   :  { %p925_p7 = pnand %p924_p6, %p918_p3 }
   0xe   :  { %928 = shalt.err (!%p925_p7)
}
   0xf   :  { %s932_s7 = smov 256   ;;  %s933_s8 = smov 16  }
  0x10   :  { %31 = dma.hbm_to_vmem [thread:$0]  %s1032_s4, 8192, %s26_s22, [#allocation3], %s932_s7, %s932_s7, %s933_s8  }
  0x11   :  { %929 = dma.done.wait [#allocation3], 8192  }
  0x12   :  { %930 = vsyncadd [#allocation3], 4294959104  ;;  %v934_v0 = vmov 0.0   ;;  %vm935_vm0 = vmmov 0   ;;  %v785_v1 = vld [vmem:[%s1030_s2] sm:$0xff]   ;;  %v786_v2 = vld [vmem:[%s1030_s2 + $0x8] sm:$0xff]  }
  0x13   :  { %760 = vmatprep.subr.bf16.mxu0 %v934_v0  ;;  %776 = vmatprep.mubr.msk.bf16.mxu0 %vm935_vm0, %v934_v0  ;;  %v787_v3 = vld [vmem:[%s1030_s2 + $0x10] sm:$0xff]   ;;  %v788_v5 = vld [vmem:[%s1030_s2 + $0x18] sm:$0xff]   ;;  %v789_v8 = vld [vmem:[%s1030_s2 + $0x20] sm:$0xff]  }
  0x14   :  { %761 = vmatpush3.bf16.msra.mxu0 %v785_v1  ;;  %v793_v4 = vld [vmem:[#allocation2 + $0x4] ss:$16 sps:$4 sm:$0xff]   ;;  %v798_v6 = vld [vmem:[#allocation2] ss:$16 sps:$4 sm:$0xff]   ;;  %v790_v13 = vld [vmem:[%s1030_s2 + $0x28] sm:$0xff]  }
  0x15   :  { %762 = vmatprep.subr.bf16.mxu0 %v934_v0  ;;  %562 = vmatprep.subr.bf16.mxu1 %v793_v4  ;;  %v799_v7 = vld [vmem:[#allocation2 + $0x24] ss:$16 sps:$4 sm:$0xff]   ;;  %v804_v9 = vld [vmem:[#allocation2 + $0x20] ss:$16 sps:$4 sm:$0xff]   ;;  %v792_v19 = vld [vmem:[%s1030_s2 + $0x38] sm:$0xff]  }
  0x16   :  { %563 = vmatpush1.bf16.msra.mxu1 %v798_v6  ;;  %v805_v10 = vld [vmem:[#allocation2 + $0x44] ss:$16 sps:$4 sm:$0xff]   ;;  %v810_v11 = vld [vmem:[#allocation2 + $0x40] ss:$16 sps:$4 sm:$0xff]   ;;  %v797_v21 = vld [vmem:[#allocation2 + $0xc] ss:$16 sps:$4 sm:$0xff]  }
  0x17   :  { %564 = vmatprep.subr.bf16.mxu1 %v799_v7  ;;  %v811_v12 = vld [vmem:[#allocation2 + $0x64] ss:$16 sps:$4 sm:$0xff]   ;;  %v816_v14 = vld [vmem:[#allocation2 + $0x60] ss:$16 sps:$4 sm:$0xff]   ;;  %v795_v25 = vld [vmem:[#allocation2 + $0x8] ss:$16 sps:$4 sm:$0xff]  }
  0x18   :  { %763 = vmatpush3.bf16.msra.mxu0 %v786_v2  ;;  %v817_v15 = vld [vmem:[#allocation2 + $0x84] ss:$16 sps:$4 sm:$0xff]   ;;  %v822_v17 = vld [vmem:[#allocation2 + $0x80] ss:$16 sps:$4 sm:$0xff]   ;;  %v803_v26 = vld [vmem:[#allocation2 + $0x2c] ss:$16 sps:$4 sm:$0xff]  }
  0x19   :  { %764 = vmatprep.subr.bf16.mxu0 %v934_v0  ;;  %v791_v16 = vld [vmem:[%s1030_s2 + $0x30] sm:$0xff]   ;;  %v38_v20 = vld [vmem:[%s1028_s0] sm:$0xff]  ;;  %v801_v29 = vld [vmem:[#allocation2 + $0x28] ss:$16 sps:$4 sm:$0xff]  }
  0x1a   :  { %565 = vmatpush1.bf16.msra.mxu1 %v804_v9  ;;  %v823_v18 = vld [vmem:[#allocation2 + $0xa4] ss:$16 sps:$4 sm:$0xff]   ;;  %v828_v22 = vld [vmem:[#allocation2 + $0xa0] ss:$16 sps:$4 sm:$0xff]   ;;  %v39_v23 = vpack.c.bf16 %v38_v20, %v38_v20  ;;  %v809_v30 = vld [vmem:[#allocation2 + $0x4c] ss:$16 sps:$4 sm:$0xff]  }
  0x1b   :  { %566 = vmatprep.subr.bf16.mxu1 %v805_v10  ;;  %v829_v24 = vld [vmem:[#allocation2 + $0xc4] ss:$16 sps:$4 sm:$0xff]   ;;  %v834_v27 = vld [vmem:[#allocation2 + $0xc0] ss:$16 sps:$4 sm:$0xff]   ;;  %v807_v33 = vld [vmem:[#allocation2 + $0x48] ss:$16 sps:$4 sm:$0xff]  }
  0x1c   :  { %765 = vmatpush3.bf16.msra.mxu0 %v787_v3  ;;  %v835_v28 = vld [vmem:[#allocation2 + $0xe4] ss:$16 sps:$4 sm:$0xff]   ;;  %v840_v31 = vld [vmem:[#allocation2 + $0xe0] ss:$16 sps:$4 sm:$0xff]   ;;  %v815_v34 = vld [vmem:[#allocation2 + $0x6c] ss:$16 sps:$4 sm:$0xff]  }
  0x1d   :  { %766 = vmatprep.subr.bf16.mxu0 %v934_v0  ;;  %v841_v32 = vld [vmem:[#allocation2 + $0x104] ss:$16 sps:$4 sm:$0xff]   ;;  %v813_v35 = vld [vmem:[#allocation2 + $0x68] ss:$16 sps:$4 sm:$0xff]   ;;  %v846_v36 = vld [vmem:[#allocation2 + $0x100] ss:$16 sps:$4 sm:$0xff]  }
  0x1e   :  { %567 = vmatpush1.bf16.msra.mxu1 %v810_v11  ;;  %v847_v37 = vld [vmem:[#allocation2 + $0x124] ss:$16 sps:$4 sm:$0xff]   ;;  %v821_v38 = vld [vmem:[#allocation2 + $0x8c] ss:$16 sps:$4 sm:$0xff]   ;;  %v852_v39 = vld [vmem:[#allocation2 + $0x120] ss:$16 sps:$4 sm:$0xff]  }
  0x1f   :  { %568 = vmatprep.subr.bf16.mxu1 %v811_v12  ;;  %v853_v40 = vld [vmem:[#allocation2 + $0x144] ss:$16 sps:$4 sm:$0xff]   ;;  %v819_v41 = vld [vmem:[#allocation2 + $0x88] ss:$16 sps:$4 sm:$0xff]   ;;  %v827_v42 = vld [vmem:[#allocation2 + $0xac] ss:$16 sps:$4 sm:$0xff]  }
  0x20   :  { %767 = vmatpush3.bf16.msra.mxu0 %v788_v5  ;;  %v858_v43 = vld [vmem:[#allocation2 + $0x140] ss:$16 sps:$4 sm:$0xff]   ;;  %v859_v44 = vld [vmem:[#allocation2 + $0x164] ss:$16 sps:$4 sm:$0xff]   ;;  %v825_v45 = vld [vmem:[#allocation2 + $0xa8] ss:$16 sps:$4 sm:$0xff]  }
  0x21   :  { %768 = vmatprep.subr.bf16.mxu0 %v934_v0  ;;  %v833_v46 = vld [vmem:[#allocation2 + $0xcc] ss:$16 sps:$4 sm:$0xff]   ;;  %v864_v47 = vld [vmem:[#allocation2 + $0x160] ss:$16 sps:$4 sm:$0xff]   ;;  %v831_v48 = vld [vmem:[#allocation2 + $0xc8] ss:$16 sps:$4 sm:$0xff]  }
  0x22   :  { %569 = vmatpush1.bf16.msra.mxu1 %v816_v14  ;;  %v839_v49 = vld [vmem:[#allocation2 + $0xec] ss:$16 sps:$4 sm:$0xff]   ;;  %v837_v50 = vld [vmem:[#allocation2 + $0xe8] ss:$16 sps:$4 sm:$0xff]   ;;  %v865_v59 = vld [vmem:[#allocation2 + $0x184] ss:$16 sps:$4 sm:$0xff]  }
  0x23   :  { %570 = vmatprep.subr.bf16.mxu1 %v817_v15  ;;  %v845_v51 = vld [vmem:[#allocation2 + $0x10c] ss:$16 sps:$4 sm:$0xff]   ;;  %v843_v52 = vld [vmem:[#allocation2 + $0x108] ss:$16 sps:$4 sm:$0xff]   ;;  %v870_v62 = vld [vmem:[#allocation2 + $0x180] ss:$16 sps:$4 sm:$0xff]  }
  0x24   :  { %769 = vmatpush3.bf16.msra.mxu0 %v789_v8  ;;  %v851_v53 = vld [vmem:[#allocation2 + $0x12c] ss:$16 sps:$4 sm:$0xff]   ;;  %v849_v54 = vld [vmem:[#allocation2 + $0x128] ss:$16 sps:$4 sm:$0xff]   ;;  %v871_v63 = vld [vmem:[#allocation2 + $0x1a4] ss:$16 sps:$4 sm:$0xff]  }
  0x25   :  { %770 = vmatprep.subr.bf16.mxu0 %v934_v0  ;;  %v857_v55 = vld [vmem:[#allocation2 + $0x14c] ss:$16 sps:$4 sm:$0xff]   ;;  %v855_v56 = vld [vmem:[#allocation2 + $0x148] ss:$16 sps:$4 sm:$0xff]   ;;  %v876_v2 = vld [vmem:[#allocation2 + $0x1a0] ss:$16 sps:$4 sm:$0xff]  }
  0x26   :  { %571 = vmatpush1.bf16.msra.mxu1 %v822_v17  ;;  %v863_v57 = vld [vmem:[#allocation2 + $0x16c] ss:$16 sps:$4 sm:$0xff]   ;;  %v861_v58 = vld [vmem:[#allocation2 + $0x168] ss:$16 sps:$4 sm:$0xff]   ;;  %v877_v3 = vld [vmem:[#allocation2 + $0x1c4] ss:$16 sps:$4 sm:$0xff]  }
  0x27   :  { %572 = vmatprep.subr.bf16.mxu1 %v823_v18  ;;  %v869_v60 = vld [vmem:[#allocation2 + $0x18c] ss:$16 sps:$4 sm:$0xff]   ;;  %v867_v61 = vld [vmem:[#allocation2 + $0x188] ss:$16 sps:$4 sm:$0xff]   ;;  %v882_v6 = vld [vmem:[#allocation2 + $0x1c0] ss:$16 sps:$4 sm:$0xff]  }
  0x28   :  { %771 = vmatpush3.bf16.msra.mxu0 %v790_v13  ;;  %v873_v1 = vld [vmem:[#allocation2 + $0x1a8] ss:$16 sps:$4 sm:$0xff]   ;;  %v881_v4 = vld [vmem:[#allocation2 + $0x1cc] ss:$16 sps:$4 sm:$0xff]   ;;  %v883_v7 = vld [vmem:[#allocation2 + $0x1e4] ss:$16 sps:$4 sm:$0xff]  }
  0x29   :  { %772 = vmatprep.subr.bf16.mxu0 %v934_v0  ;;  %v879_v5 = vld [vmem:[#allocation2 + $0x1c8] ss:$16 sps:$4 sm:$0xff]   ;;  %v887_v8 = vld [vmem:[#allocation2 + $0x1ec] ss:$16 sps:$4 sm:$0xff]   ;;  %v888_v10 = vld [vmem:[#allocation2 + $0x1e0] ss:$16 sps:$4 sm:$0xff]  }
  0x2a   :  { %573 = vmatpush1.bf16.msra.mxu1 %v828_v22  ;;  %v885_v9 = vld [vmem:[#allocation2 + $0x1e8] ss:$16 sps:$4 sm:$0xff]   ;;  %v152_v11 = vld [vmem:[%s1029_s1] sm:$0xff] }
  0x2b   :  { %574 = vmatprep.subr.bf16.mxu1 %v829_v24  ;;  %v155_v12 = vpack.c.bf16 %v152_v11, %v152_v11  ;;  %v675_v13 = vld [vmem:[%s1031_s3] ss:$0 sm:$0xff] }
  0x2c   :  { %773 = vmatpush3.bf16.msra.mxu0 %v791_v16  ;;  %v220_v24 = vld [vmem:[%s1033_s5] sm:$0xf] }
  0x2d   :  { %774 = vmatprep.subr.bf16.mxu0 %v934_v0  ;;  %v875_v0 = vld [vmem:[#allocation2 + $0x1ac] ss:$16 sps:$4 sm:$0xff]   ;;  %594 = vmatprep.mubr.bf16.mxu1 %v155_v12 }
  0x2e   :  { %575 = vmatpush1.bf16.msra.mxu1 %v834_v27 }
  0x2f   :  { %576 = vmatprep.subr.bf16.mxu1 %v835_v28 }
  0x30   :  { %775 = vmatpush3.bf16.msra.mxu0 %v792_v19 }
  0x31   :  { %603 = vmatprep.subr.bf16.mxu0 %v797_v21  ;;  %v222_v21 = vlaneseq }
  0x32   :  { %577 = vmatpush1.bf16.msra.mxu1 %v840_v31 }
  0x33   :  { %777 = vmatmul.mubr.bf16.vlgmr.msra.gmra.mrb[0].mxu0 %v39_v23  ;;  %578 = vmatprep.subr.bf16.mxu1 %v841_v32  ;;  %v223_v22 = vshrl.u32 %v222_v21, 7 }
  0x34   :  { %604 = vmatpush1.bf16.msra.mxu0 %v795_v25  ;;  %635 = vmatprep.mubr.bf16.mxu0 %v155_v12 }
  0x35   :  { %605 = vmatprep.subr.bf16.mxu0 %v803_v26  ;;  %v224_v23 = vsub.s32 0, %v223_v22  ;;  %v228_v25 = vsub.s32 1, %v223_v22 }
  0x36   :  { %579 = vmatpush1.bf16.msra.mxu1 %v846_v36 }
  0x37   :  { %580 = vmatprep.subr.bf16.mxu1 %v847_v37  ;;  %v225_v26 = vrot.slane %v220_v24, %v224_v23  ;;  %v229_v27 = vrot.slane %v220_v24, %v228_v25 }
  0x38   :  { %606 = vmatpush1.bf16.msra.mxu0 %v801_v29 }
  0x39   :  { %607 = vmatprep.subr.bf16.mxu0 %v809_v30  ;;  %v236_v30 = vsub.s32 3, %v223_v22 }
  0x3a   :  { %581 = vmatpush1.bf16.msra.mxu1 %v852_v39 }
  0x3b   :  { %582 = vmatprep.subr.bf16.mxu1 %v853_v40 }
  0x3c   :  { %608 = vmatpush1.bf16.msra.mxu0 %v807_v33 }
  0x3d   :  { %609 = vmatprep.subr.bf16.mxu0 %v815_v34 }
  0x3e   :  { %583 = vmatpush1.bf16.msra.mxu1 %v858_v43 }
  0x3f   :  { %584 = vmatprep.subr.bf16.mxu1 %v859_v44 }
  0x40   :  { %610 = vmatpush1.bf16.msra.mxu0 %v813_v35 }
  0x41   :  { %611 = vmatprep.subr.bf16.mxu0 %v821_v38 }
  0x42   :  { %585 = vmatpush1.bf16.msra.mxu1 %v864_v47 }
  0x43   :  { %586 = vmatprep.subr.bf16.mxu1 %v865_v59 }
  0x44   :  { %612 = vmatpush1.bf16.msra.mxu0 %v819_v41  ;;  %v237_v41 = vrot.slane %v220_v24, %v236_v30 }
  0x45   :  { %613 = vmatprep.subr.bf16.mxu0 %v827_v42  ;;  %v232_v42 = vsub.s32 2, %v223_v22 }
  0x46   :  { %587 = vmatpush1.bf16.msra.mxu1 %v870_v62 }
  0x47   :  { %588 = vmatprep.subr.bf16.mxu1 %v871_v63  ;;  %v233_v44 = vrot.slane %v220_v24, %v232_v42 }
  0x48   :  { %614 = vmatpush1.bf16.msra.mxu0 %v825_v45 }
  0x49   :  { %615 = vmatprep.subr.bf16.mxu0 %v833_v46 }
  0x4a   :  { %589 = vmatpush1.bf16.msra.mxu1 %v876_v2 }
  0x4b   :  { %590 = vmatprep.subr.bf16.mxu1 %v877_v3 }
  0x4c   :  { %616 = vmatpush1.bf16.msra.mxu0 %v831_v48 }
  0x4d   :  { %617 = vmatprep.subr.bf16.mxu0 %v839_v49 }
  0x4e   :  { %591 = vmatpush1.bf16.msra.mxu1 %v882_v6 }
  0x4f   :  { %592 = vmatprep.subr.bf16.mxu1 %v883_v7 }
  0x50   :  { %618 = vmatpush1.bf16.msra.mxu0 %v837_v50 }
  0x51   :  { %619 = vmatprep.subr.bf16.mxu0 %v845_v51 }
  0x52   :  { %593 = vmatpush1.bf16.msra.mxu1 %v888_v10 }
  0x54   :  { %620 = vmatpush1.bf16.msra.mxu0 %v843_v52 }
  0x55   :  { %621 = vmatprep.subr.bf16.mxu0 %v851_v53  ;;  %v153_v53 = vld [vmem:[%s1029_s1 + $0x8] sm:$0xff] }
  0x58   :  { %622 = vmatpush1.bf16.msra.mxu0 %v849_v54 }
  0x59   :  { %623 = vmatprep.subr.bf16.mxu0 %v857_v55 }
  0x5c   :  { %624 = vmatpush1.bf16.msra.mxu0 %v855_v56 }
  0x5d   :  { %625 = vmatprep.subr.bf16.mxu0 %v863_v57 }
  0x60   :  { %626 = vmatpush1.bf16.msra.mxu0 %v861_v58 }
  0x61   :  { %627 = vmatprep.subr.bf16.mxu0 %v869_v60 }
  0x64   :  { %628 = vmatpush1.bf16.msra.mxu0 %v867_v61 }
  0x65   :  { %629 = vmatprep.subr.bf16.mxu0 %v875_v0 }
  0x68   :  { %630 = vmatpush1.bf16.msra.mxu0 %v873_v1 }
  0x69   :  { %631 = vmatprep.subr.bf16.mxu0 %v881_v4 }
  0x6c   :  { %632 = vmatpush1.bf16.msra.mxu0 %v879_v5 }
  0x6d   :  { %633 = vmatprep.subr.bf16.mxu0 %v887_v8 }
  0x70   :  { %634 = vmatpush1.bf16.msra.mxu0 %v885_v9 }
 0x106   :  { %v145_v14 = vpop.f32.mrb[0].mxu0 }
 0x107   :  { %v146_v15 = vadd.f32 %v675_v13, %v145_v14  ;;  %v778_v16 = vpop.f32.mrb[1].mxu0 }
 0x108   :  { %v148_v17 = vpop.f32.mrb[2].mxu0 }
 0x109   :  { %889 = vtanh.f32 %v146_v15  ;;  %v779_v18 = vpop.f32.mrb[3].mxu0 }
 0x113   :  { %v890_v19 = vpop.eup %889 }
 0x114   :  { %v154_v20 = vpack.c.bf16 %v890_v19, %v890_v19 }
 0x116   :  { %595 = vmatmul.mubr.bf16.vlgmr.msra.gmra.mrb[0].mxu1 %v154_v20  ;;  %636 = vmatmul.mubr.bf16.vlgmr.msra.gmra.mrb[4].mxu0 %v154_v20 }
 0x1e9   :  { %v596_v28 = vpop.f32.mrb[0].mxu1  ;;  %v637_v29 = vpop.f32.mrb[4].mxu0 }
 0x1ea   :  { %v597_v31 = vadd.f32 %v596_v28, %v225_v26  ;;  %v598_v32 = vpop.f32.mrb[1].mxu1  ;;  %v639_v33 = vpop.f32.mrb[5].mxu0  ;;  %v638_v46 = vadd.f32 %v637_v29, %v233_v44 }
 0x1eb   :  { %v599_v34 = vadd.f32 %v598_v32, %v229_v27  ;;  %v600_v35 = vpop.f32.mrb[2].mxu1  ;;  %v641_v36 = vpop.f32.mrb[6].mxu0  ;;  %v640_v43 = vadd.f32 %v639_v33, %v237_v41 }
 0x1ec   :  { %v748_v37 = vmul.f32 -1.442695, %v597_v31  ;;  %v601_v38 = vpop.f32.mrb[3].mxu1  ;;  %v642_v39 = vpop.f32.mrb[7].mxu0 }
 0x1ed   :  { %v749_v40 = vmul.f32 -1.442695, %v599_v34  ;;  %v750_v45 = vmul.f32 -1.442695, %v640_v43 }
 0x1ee   :  { %891 = vpow2.f32 %v748_v37 }
 0x1ef   :  { %893 = vpow2.f32 %v749_v40 }
 0x1f0   :  { %895 = vpow2.f32 %v750_v45 }
 0x1f1   :  { %897 = vtanh.f32 %v638_v46 }
 0x1f8   :  { %v892_v47 = vpop.eup %891 }
 0x1f9   :  { %v894_v48 = vpop.eup %893  ;;  %v647_v49 = vadd.f32 1.0, %v892_v47 }
 0x1fa   :  { %v653_v50 = vadd.f32 1.0, %v894_v48  ;;  %v896_v51 = vpop.eup %895 }
 0x1fb   :  { %899 = vrcp.f32 %v647_v49  ;;  %v898_v52 = vpop.eup %897  ;;  %v660_v57 = vadd.f32 1.0, %v896_v51 }
 0x1fc   :  { %901 = vrcp.f32 %v653_v50 }
 0x1fd   :  { %903 = vrcp.f32 %v660_v57 }
 0x205   :  { %v900_v54 = vpop.eup %899 }
 0x206   :  { %v902_v55 = vpop.eup %901  ;;  %v664_v56 = vmul.f32 %v900_v54, %v898_v52 }
 0x207   :  { %v663_v58 = vmul.f32 %v902_v55, %v153_v53  ;;  %v904_v60 = vpop.eup %903 }
 0x209   :  { %v665_v59 = vadd.f32 %v664_v56, %v663_v58 }
 0x20b   :  { %905 = vtanh.f32 %v665_v59  ;;  %669 = vst [vmem:[%s1034_s6 + $0x8] sm:$0xff] %v665_v59 }
 0x215   :  { %v906_v61 = vpop.eup %905 }
 0x216   :  { %v667_v62 = vmul.f32 %v906_v61, %v904_v60 }
 0x218   :  { %668 = vst [vmem:[%s1034_s6] sm:$0xff] %v667_v62 }
 0x219   :  { %674 = vsyncpa [#allocation3], 1 }

</bundles_post_ra>
